<compile_context>
chip_gen: v7x
topology: tpu7x:2x2x1
jax: 0.10.0
libtpu: 0.0.40
codegen_flags: <defaults>
</compile_context>

<pallas_src>
import jax
import jax.numpy as jnp
from jax.experimental import pallas as pl
from jax.experimental.pallas import tpu as pltpu

EPS = 1e-5
N_BRANCH = 3
KMAX = 7            # all branch convs zero-padded to 7 centred taps (pad = 3)
CENTER = KMAX // 2
N_FILTERS = 4       # "bottleneck" in MultiKernel.__init__
FP = 8              # F=4 filter rows padded to 8 -> sublane-tile aligned slices
N_BLOCKS = 3


def _elu(x):
    return jnp.where(x > 0, x, jnp.expm1(jnp.minimum(x, 0.0)))


# ---------------------------------------------------------------------------
# pltpu.roll convention probe (expected to match jnp.roll: out[l] = in[l-shift])
# ---------------------------------------------------------------------------
_ROLL_SIGN = None


def _roll_sign():
    global _ROLL_SIGN
    if _ROLL_SIGN is None:
        def probe(x_ref, o_ref):
            o_ref[...] = pltpu.roll(x_ref[...], 1, axis=1)

        xp = jnp.tile(jnp.arange(128, dtype=jnp.float32)[None, :], (8, 1))
        out = pl.pallas_call(
            probe, out_shape=jax.ShapeDtypeStruct((8, 128), jnp.float32))(xp)
        # jnp.roll convention puts x[127] at position 0 after shift=+1.
        _ROLL_SIGN = 1 if int(out[0, 0]) == 127 else -1
    return _ROLL_SIGN


# ---------------------------------------------------------------------------
# fused MultiKernel kernel
# ---------------------------------------------------------------------------
def _make_multikernel_kernel(n_blocks, count, npad, roll_sign):
    inv_count = 1.0 / float(count)

    def kernel(x_ref, mask_ref, w1_ref, b1_ref, bg_ref, bb_ref, wk_ref,
               g1_ref, be1_ref, w11_ref, b11_ref, g2_ref, be2_ref, o_ref):
        mask = mask_ref[...]                       # (1, Npad); 1.0 on valid cols

        def bn_scale_shift(v, gamma, beta):
            # Training-mode BatchNorm1d stats over the valid B*L columns,
            # folded to per-row scale/shift (single slab-wide FMA to apply).
            vm = v * mask
            s1 = jnp.sum(vm, axis=1, keepdims=True)
            s2 = jnp.sum(vm * vm, axis=1, keepdims=True)
            mu = s1 * inv_count
            var = s2 * inv_count - mu * mu
            scale = gamma * jax.lax.rsqrt(var + EPS)
            return scale, beta - mu * scale

        x = x_ref[...]                             # (C, Npad)
        for blk in range(n_blocks):
            # 3 branch Conv1d(C->F, k=1) fused into one (3F, C)@(C, N) matmul.
            y = jnp.dot(w1_ref[blk], x, preferred_element_type=jnp.float32)
            y = _elu(y + b1_ref[blk])
            # Per-branch BatchNorm1d(F) as scale/shift; the same expression also
            # zeroes the pad columns so they act as the k-tap conv zero padding.
            sc, sh = bn_scale_shift(y, bg_ref[blk], bb_ref[blk])
            ym = (y * sc + sh) * mask
            # 3 branch Conv1d(F->F, k=ks) + branch-sum as ONE stacked-tap matmul
            # (7 tap groups x FP=8 rows), then static XLU lane rotations
            # accumulated on the VPU, starting from the centre tap.
            taps = jnp.dot(wk_ref[blk], ym, preferred_element_type=jnp.float32)
            conv = taps[CENTER * FP:(CENTER + 1) * FP, :]
            for t in range(KMAX):
                if t == CENTER:
                    continue
                shift = (roll_sign * (CENTER - t)) % npad
                conv = conv + pltpu.roll(taps[t * FP:(t + 1) * FP, :], shift,
                                         axis=1)
            # Branch-conv biases intentionally omitted: a per-channel constant
            # feeding training-mode bn1 cancels exactly in the mean subtraction.
            # bn1 applied as one fused scale/shift pass over FP rows.
            sc1, sh1 = bn_scale_shift(conv, g1_ref[blk], be1_ref[blk])
            acc = conv * sc1 + sh1
            # conv1x1(F->C) + residual + ELU + bn2.
            z = jnp.dot(w11_ref[blk], acc, preferred_element_type=jnp.float32)
            z = _elu(z + b11_ref[blk] + x)
            sc2, sh2 = bn_scale_shift(z, g2_ref[blk], be2_ref[blk])
            x = z * sc2 + sh2                      # pad cols stay garbage (OK)
        o_ref[...] = x

    return kernel


def _pack_block_params(block_params):
    """Stack per-block params, pre-fuse the branch weights, and pad the F=4
    filter rows of the k-tap path to FP=8 so in-kernel slices are tile-aligned."""
    f = N_FILTERS

    def stack(fn):
        return jnp.stack([fn(p) for p in block_params])

    w1 = stack(lambda p: p['w1'].reshape(N_BRANCH * f, -1))      # (NB, 3F, C)
    b1 = stack(lambda p: p['b1'].reshape(N_BRANCH * f, 1))
    bg = stack(lambda p: p['bg'].reshape(N_BRANCH * f, 1))
    bb = stack(lambda p: p['bb'].reshape(N_BRANCH * f, 1))

    def pack_wk(p):
        # (br, t, o, i) -> rows t*FP + o (rows F..FP-1 zero), cols br*F + i.
        w = jnp.transpose(p['wk'], (1, 2, 0, 3))                 # (t, o, br, i)
        w = jnp.pad(w, ((0, 0), (0, FP - f), (0, 0), (0, 0)))
        return w.reshape(KMAX * FP, N_BRANCH * f)

    wk = stack(pack_wk)                                          # (NB, 7*FP, 3F)
    pad_rows = lambda a: jnp.pad(a, ((0, FP - f), (0, 0)))
    g1 = stack(lambda p: pad_rows(p['g1']))                      # (NB, FP, 1)
    be1 = stack(lambda p: pad_rows(p['be1']))
    w11 = stack(lambda p: jnp.pad(p['w11'], ((0, 0), (0, FP - f))))  # (NB, C, FP)
    b11 = stack(lambda p: p['b11'])
    g2 = stack(lambda p: p['g2'])
    be2 = stack(lambda p: p['be2'])
    # p['bk'] is not packed: training-mode bn1 cancels the branch-conv bias.
    return (w1, b1, bg, bb, wk, g1, be1, w11, b11, g2, be2)


def _full_spec(shape):
    nd = len(shape)
    return pl.BlockSpec(shape, lambda i, _nd=nd: (0,) * _nd)


def multi_kernel_forward(x, block_params):
    """x: (B, C, L) float32 (PyTorch NCL convention)."""
    B, C, L = x.shape
    # Per-batch length padded to a multiple of 128 lanes; the >= KMAX//2 zero
    # lanes of tail slack double as the "same"-conv zero padding so the lane
    # rotations never leak data across batch-segment boundaries.
    Lpad = ((L + CENTER + 127) // 128) * 128
    assert Lpad - L >= CENTER, "need >= KMAX//2 zero lanes of per-batch slack"
    Npad = B * Lpad

    x2 = jnp.transpose(x, (1, 0, 2))                             # (C, B, L)
    x2 = jnp.pad(x2, ((0, 0), (0, 0), (0, Lpad - L))).reshape(C, Npad)
    mask = jnp.tile(jnp.arange(Lpad) < L, (B,)).astype(jnp.float32)
    mask = mask.reshape(1, Npad)

    args = (x2, mask) + _pack_block_params(block_params)
    kernel = _make_multikernel_kernel(len(block_params), B * L, Npad,
                                      _roll_sign())

    out2 = pl.pallas_call(
        kernel,
        out_shape=jax.ShapeDtypeStruct((C, Npad), jnp.float32),
        grid_spec=pltpu.PrefetchScalarGridSpec(
            num_scalar_prefetch=0,
            grid=(1,),   # everything resident in a single step at this size
            # TODO(synk): when B*Lpad outgrows VMEM, tile the lane axis with a
            # "parallel" grid dim (2 TCs on v7x) and switch BN to a two-pass
            # (stats, then normalize) scheme, since training BN stats are
            # global over B*L.
            in_specs=[_full_spec(a.shape) for a in args],
            out_specs=_full_spec((C, Npad))),
        compiler_params=pltpu.CompilerParams(
            dimension_semantics=("arbitrary",),
            # explicit scoped-VMEM budget (v5e default is only 16 MiB); raise
            # toward 64 MiB (v7x physical) / 128 MiB (v5e/v6e) when the
            # resident slab grows.
            vmem_limit_bytes=32 * 1024 * 1024),
    )(*args)

    return jnp.transpose(out2.reshape(C, B, Lpad)[:, :, :L], (1, 0, 2))


# ----------------------- deterministic parameter init -----------------------
def init_block_params(key, C, kernel_sizes=(3, 5, 7)):
    F = N_FILTERS
    ks = jax.random.split(key, 6)

    def u(k, shape, fan_in):
        b = float(fan_in) ** -0.5
        return jax.random.uniform(k, shape, jnp.float32, -b, b)

    w1 = u(ks[0], (N_BRANCH, F, C), C)                 # Conv1d(C->F, k=1)
    b1 = u(ks[1], (N_BRANCH, F, 1), C)
    wk = u(ks[2], (N_BRANCH, KMAX, F, F), F * KMAX)    # (br, tap, out, in)
    # zero taps outside each branch's true kernel size (3 / 5 / 7, centred)
    mask = jnp.zeros((N_BRANCH, KMAX, 1, 1), jnp.float32)
    for i, k_sz in enumerate(kernel_sizes):
        lo = (KMAX - k_sz) // 2
        mask = mask.at[i, lo:lo + k_sz].set(1.0)
    wk = wk * mask
    bk = u(ks[3], (N_BRANCH, F, 1), F * KMAX)
    w11 = u(ks[4], (C, F), F)                          # Conv1d(F->C, k=1)
    b11 = u(ks[5], (C, 1), F)
    return dict(
        w1=w1, b1=b1,
        bg=jnp.ones((N_BRANCH, F, 1), jnp.float32),    # branch BN gamma
        bb=jnp.zeros((N_BRANCH, F, 1), jnp.float32),   # branch BN beta
        wk=wk, bk=bk,
        g1=jnp.ones((F, 1), jnp.float32), be1=jnp.zeros((F, 1), jnp.float32),
        w11=w11, b11=b11,
        g2=jnp.ones((C, 1), jnp.float32), be2=jnp.zeros((C, 1), jnp.float32),
    )


# ---------------------------- pure-JAX reference ----------------------------
def _conv1d_ref(x, w, b, pad):
    # x: (B, Ci, L), w: (Co, Ci, K), b: (Co,)
    B, Ci, L = x.shape
    Co, _, K = w.shape
    xp = jnp.pad(x, ((0, 0), (0, 0), (pad, pad)))
    out = jnp.zeros((B, Co, L), jnp.float32)
    for t in range(K):
        out = out + jnp.einsum('oc,bcl->bol', w[:, :, t], xp[:, :, t:t + L])
    return out + b.reshape(1, -1, 1)


def _bn_ref(x, gamma, beta):
    mu = x.mean(axis=(0, 2), keepdims=True)
    var = ((x - mu) ** 2).mean(axis=(0, 2), keepdims=True)
    return (x - mu) / jnp.sqrt(var + EPS) * gamma.reshape(1, -1, 1) \
        + beta.reshape(1, -1, 1)


def _elu_ref(x):
    return jnp.where(x > 0, x, jnp.expm1(x))


def single_block_ref(x, p):
    acc = jnp.zeros((x.shape[0], N_FILTERS, x.shape[2]), jnp.float32)
    for br in range(N_BRANCH):
        y = _conv1d_ref(x, p['w1'][br][:, :, None], p['b1'][br, :, 0], 0)
        y = _elu_ref(y)
        y = _bn_ref(y, p['bg'][br, :, 0], p['bb'][br, :, 0])
        w = jnp.transpose(p['wk'][br], (1, 2, 0))      # (F, F, 7)
        acc = acc + _conv1d_ref(y, w, p['bk'][br, :, 0], 3)
    acc = _bn_ref(acc, p['g1'][:, 0], p['be1'][:, 0])
    z = _conv1d_ref(acc, p['w11'][:, :, None], p['b11'][:, 0], 0)
    z = _elu_ref(z + x)
    return _bn_ref(z, p['g2'][:, 0], p['be2'][:, 0])


def multi_kernel_ref(x, block_params):
    for p in block_params:
        x = single_block_ref(x, p)
    return x


# ----------------------------------- main -----------------------------------
if __name__ == "__main__":
    B, C, L = 2, 8, 16          # batch, out_channels, sequence length
    key = jax.random.PRNGKey(0)
    kx, kp = jax.random.split(key)
    x = jax.random.normal(kx, (B, C, L), jnp.float32)

    block_params = [init_block_params(k, C)
                    for k in jax.random.split(kp, N_BLOCKS)]

    out = multi_kernel_forward(x, block_params)
    out = jax.block_until_ready(out)

    ref = multi_kernel_ref(x, block_params)
    assert out.shape == (B, C, L)
    err = float(jnp.max(jnp.abs(out - ref)))
    assert jnp.allclose(out, ref, atol=2e-4, rtol=2e-4), f"max abs err {err}"
    print("KERNEL_OK")
</pallas_src>

<mosaic_0001>
module attributes {stable_mosaic.version = 11 : i64} {
  func.func @probe(%arg0: memref<8x128xf32, #tpu.memory_space<vmem>>, %arg1: memref<8x128xf32, #tpu.memory_space<vmem>>) attributes {dimension_semantics = [], scalar_prefetch = 0 : i64, scratch_operands = 0 : i64, tpu.core_type = #tpu.core_type<tc>} {
    %c0 = arith.constant 0 : index
    %c0_0 = arith.constant 0 : index
    %0 = vector.load %arg0[%c0, %c0_0] : memref<8x128xf32, #tpu.memory_space<vmem>>, vector<8x128xf32>
    %c1_i32 = arith.constant 1 : i32
    %1 = tpu.dynamic_rotate %0 by %c1_i32 dim 1 : vector<8x128xf32>, i32 -> vector<8x128xf32>
    %c0_1 = arith.constant 0 : index
    %c0_2 = arith.constant 0 : index
    %2 = vector.load %arg1[%c0_1, %c0_2] : memref<8x128xf32, #tpu.memory_space<vmem>>, vector<8x128xf32>
    tpu.vector_store %arg1[%c0_1, %c0_2], %1 {strides = array<i32>} : memref<8x128xf32, #tpu.memory_space<vmem>>, vector<8x128xf32>,
    return
  }
}

</mosaic_0001>

<bundles_post_ra>
// kernel: tpu_custom_call.1
= control target key start
LH: loop header
LB: loop body
LE: loop exit
PB: predicated region body
PF: predicated region fallthrough
CT: control target
= control target key end

     0   :  { %6 = vsyncpa [#allocation3], 0  ;;  %s128_s0 = inlined_call_operand.hbm [shape: f32[8,128], index: 0, kind: input, shape index: {}]   ;;  %s129_s1 = inlined_call_operand.hbm [shape: f32[8,128], index: 1, kind: output, shape index: {}]  }
   0x1   :  { %7 = vsyncpa [#allocation4], 0  ;;  %s91_s6 = smov [#allocation2]   ;;  %s43_s10 = scalar_lea.hbm %s128_s0, 128 }
   0x2   :  { %s14_s7 = sshll.u32 %s91_s6, 4  ;;  %p44_p0 = scmp.ne.s32.totalorder %s128_s0, %s43_s10  ;;  %s15_s7 = int_to_ptr.vmem [resolvable:$true] %s14_s7 }
   0x3   :  { %p47_p1 = scmp.lt.u32.totalorder %s43_s10, %s128_s0 }
   0x5   :  { %p49_p2 = pnand %p47_p1, %p44_p0 }
   0x7   :  { %52 = shalt.err (!%p49_p2)
}
   0x8   :  { %s53_s15 = scalar_lea.vmem %s15_s7, 128  ;;  %p58_p4 = scmp.lt.s32.totalorder %s15_s7, %s15_s7 }
   0x9   :  { %p54_p3 = scmp.ne.s32.totalorder %s15_s7, %s53_s15  ;;  %p59_p5 = scmp.lt.s32.totalorder %s53_s15, %s53_s15 }
   0xb   :  { %p60_p6 = por %p59_p5, %p58_p4 }
   0xd   :  { %p61_p7 = pnand %p60_p6, %p54_p3 }
   0xf   :  { %64 = shalt.err (!%p61_p7)
}
  0x10   :  { %17 = dma.hbm_to_vmem [thread:$0]  %s128_s0, 128, %s15_s7, [#allocation3]  }
  0x11   :  { %87 = dma.done.wait [#allocation3], 128  }
  0x12   :  { %88 = vsyncadd [#allocation3], 4294967168  ;;  %v21_v0 = vld [vmem:[#allocation2] sm:$0xff]  ;;  %s92_s18 = smov 1   ;;  %s93_s19 = smov [#allocation5]  }
  0x13   :  { %22 = vrot.lane.b32.xlu0 %v21_v0, %s92_s18  ;;  %s31_s20 = sshll.u32 %s93_s19, 4  ;;  %s32_s20 = int_to_ptr.vmem [resolvable:$true] %s31_s20 }
  0x14   :  { %s65_s21 = scalar_lea.vmem %s32_s20, 128  ;;  %p70_p9 = scmp.lt.s32.totalorder %s32_s20, %s32_s20 }
  0x15   :  { %p66_p8 = scmp.ne.s32.totalorder %s32_s20, %s65_s21  ;;  %p71_p10 = scmp.lt.s32.totalorder %s65_s21, %s65_s21 }
  0x17   :  { %p72_p11 = por %p71_p10, %p70_p9 }
  0x19   :  { %p73_p12 = pnand %p72_p11, %p66_p8 }
  0x85   :  { %v23_v1 = vpop.permute.xlu0 %22 }
  0x86   :  { %24 = vst [vmem:[#allocation5] sm:$0xff] %v23_v1 }
  0x87   :  { %76 = shalt.err (!%p73_p12)
}
  0x88   :  { %s77_s0 = scalar_lea.hbm %s129_s1, 128 }
  0x89   :  { %p78_p13 = scmp.ne.s32.totalorder %s129_s1, %s77_s0  ;;  %p81_p0 = scmp.lt.u32.totalorder %s77_s0, %s129_s1 }
  0x8b   :  { %p83_p1 = pnand %p81_p0, %p78_p13 }
  0x8d   :  { %86 = shalt.err (!%p83_p1)
}
  0x8e   :  { %34 = dma.vmem_to_hbm [thread:$0]  %s32_s20, 128, %s129_s1, [#allocation4]  }
  0x8f   :  { %89 = dma.done.wait [#allocation4], 128  }
  0x90   :  { %90 = vsyncadd [#allocation4], 4294967168 }
  0x91   :  { %38 = vsyncpa [#allocation3], 1 }
  0x92   :  { %39 = vsyncpa [#allocation4], 1 }

</bundles_post_ra>
